<compile_context>
chip_gen: v6e
topology: v6e:2x2x1
jax: 0.10.0
libtpu: 0.0.40
codegen_flags: <defaults>
</compile_context>

<pallas_src>
import math
import functools

import jax
import jax.numpy as jnp
from jax import lax
from jax.experimental import pallas as pl
from jax.experimental.pallas import tpu as pltpu


def _pick_tile(n: int, cap: int, align: int = 1) -> int:
    """Largest divisor of n that is <= cap and a multiple of `align`.

    Falls back to the full dimension only when no aligned divisor exists
    (a full-dim block is always layout-legal on TPU).
    """
    if n <= cap:
        return n
    for t in range(min(n, cap), 0, -1):
        if n % t == 0 and t % align == 0:
            return t
    # TODO(synk): pad + cdiv grid with a masked tail tile instead of the
    # full-dim fallback for awkward (e.g. prime) dimensions.
    return n


# --------------------------- linear: y = x @ W^T + b -------------------------

def _linear_kernel(x_ref, w_ref, b_ref, o_ref, acc_ref):
    k = pl.program_id(2)

    @pl.when(k == 0)
    def _init():
        acc_ref[...] = jnp.zeros_like(acc_ref)

    # bf16 on the MXU, f32 accumulation.  w is (Dout, Din) (torch nn.Linear
    # layout); contract x dim 1 against w dim 1 -> no wrapper transpose.
    x = x_ref[...].astype(jnp.bfloat16)
    w = w_ref[...].astype(jnp.bfloat16)
    acc_ref[...] += lax.dot_general(
        x, w, (((1,), (1,)), ((), ())), preferred_element_type=jnp.float32)

    @pl.when(k == pl.num_programs(2) - 1)
    def _finalize():
        o_ref[...] = (acc_ref[...] + b_ref[...].astype(jnp.float32)
                      ).astype(o_ref.dtype)


def linear(x, w, b, *, tm_cap: int = 512, tn_cap: int = 512, tk_cap: int = 512):
    """x: (M, Din), w: (Dout, Din) (torch layout), b: (Dout,) -> (M, Dout)."""
    M, Din = x.shape
    Dout, _ = w.shape
    b2 = b.reshape(1, Dout)

    tm = _pick_tile(M, tm_cap, align=8)        # sublane-aligned rows
    tn = _pick_tile(Dout, tn_cap, align=128)   # lane-aligned output cols
    tk = _pick_tile(Din, tk_cap, align=128)    # lane-aligned contraction

    grid = (M // tm, Dout // tn, Din // tk)
    return pl.pallas_call(
        _linear_kernel,
        out_shape=jax.ShapeDtypeStruct((M, Dout), x.dtype),
        grid=grid,
        in_specs=[
            pl.BlockSpec((tm, tk), lambda i, j, k: (i, k)),
            pl.BlockSpec((tn, tk), lambda i, j, k: (j, k)),
            pl.BlockSpec((1, tn), lambda i, j, k: (0, j)),
        ],
        out_specs=pl.BlockSpec((tm, tn), lambda i, j, k: (i, j)),
        scratch_shapes=[pltpu.VMEM((tm, tn), jnp.float32)],
        compiler_params=pltpu.CompilerParams(
            dimension_semantics=("parallel", "parallel", "arbitrary"),
            vmem_limit_bytes=32 << 20),
    )(x, w, b2)


# ------------------ flash-style scaled dot-product attention -----------------

def _flash_attention_kernel(q_ref, k_ref, v_ref, o_ref,
                            m_ref, l_ref, acc_ref, *, scale):
    kv = pl.program_id(1)

    @pl.when(kv == 0)
    def _init():
        m_ref[...] = jnp.full(m_ref.shape, -jnp.inf, dtype=m_ref.dtype)
        l_ref[...] = jnp.zeros_like(l_ref)
        acc_ref[...] = jnp.zeros_like(acc_ref)

    q = q_ref[...].astype(jnp.bfloat16)
    k = k_ref[...].astype(jnp.bfloat16)
    s = jnp.einsum("gqd,gkd->gqk", q, k,
                   preferred_element_type=jnp.float32) * scale

    m_prev = m_ref[...]
    m_new = jnp.maximum(m_prev, jnp.max(s, axis=-1, keepdims=True))
    alpha = jnp.exp(m_prev - m_new)
    p = jnp.exp(s - m_new)

    l_ref[...] = alpha * l_ref[...] + jnp.sum(p, axis=-1, keepdims=True)
    acc_ref[...] = alpha * acc_ref[...] + jnp.einsum(
        "gqk,gkd->gqd", p.astype(jnp.bfloat16), v_ref[...].astype(jnp.bfloat16),
        preferred_element_type=jnp.float32)
    m_ref[...] = m_new

    @pl.when(kv == pl.num_programs(1) - 1)
    def _finalize():
        o_ref[...] = (acc_ref[...] * pl.reciprocal(l_ref[...], approx=True)
                      ).astype(o_ref.dtype)


def scaled_dot_product_attention(qh, kh, vh, *, scale,
                                 vmem_budget_bytes: int = 16 << 20,
                                 kv_tile_cap: int = 512):
    """qh: (BH, Lq, Dh), kh/vh: (BH, Lk, Dh) -> (BH, Lq, Dh)."""
    BH, Lq, Dh = qh.shape
    _, Lk, _ = kh.shape

    tk = _pick_tile(Lk, kv_tile_cap, align=8)   # kv-sequence tile

    # Conservative f32 bytes per head inside one block, counting pipeline
    # double-buffering on q/k/v/o plus the online-softmax scratch and the
    # score / exp temporaries.
    per_head = 4 * (
        2 * (Lq * Dh)          # q block, double-buffered
        + 2 * 2 * (tk * Dh)    # k + v blocks, double-buffered
        + 2 * (Lq * Dh)        # output block, double-buffered
        + (Lq * Dh + 2 * Lq)   # acc / m / l scratch
        + 3 * (Lq * tk)        # scores, exp, weighted temporaries
    )
    g_cap = max(1, vmem_budget_bytes // max(per_head, 1))
    g_cap = min(g_cap, max(1, BH // 2))   # keep >= 2 grid steps along BH
    g = _pick_tile(BH, g_cap)

    kernel = functools.partial(_flash_attention_kernel, scale=scale)
    return pl.pallas_call(
        kernel,
        out_shape=jax.ShapeDtypeStruct((BH, Lq, Dh), qh.dtype),
        grid=(BH // g, Lk // tk),
        in_specs=[
            pl.BlockSpec((g, Lq, Dh), lambda i, j: (i, 0, 0)),
            pl.BlockSpec((g, tk, Dh), lambda i, j: (i, j, 0)),
            pl.BlockSpec((g, tk, Dh), lambda i, j: (i, j, 0)),
        ],
        out_specs=pl.BlockSpec((g, Lq, Dh), lambda i, j: (i, 0, 0)),
        scratch_shapes=[
            pltpu.VMEM((g, Lq, 1), jnp.float32),    # running max
            pltpu.VMEM((g, Lq, 1), jnp.float32),    # running denom
            pltpu.VMEM((g, Lq, Dh), jnp.float32),   # running weighted sum
        ],
        compiler_params=pltpu.CompilerParams(
            dimension_semantics=("parallel", "arbitrary"),
            vmem_limit_bytes=32 << 20),
    )(qh, kh, vh)


# ------------------------------ full forward ---------------------------------

def multihead_attention(q, k, v, params, *, n_head, attn_mask=None):
    """Mirrors the PyTorch MultiheadAttention.forward (attn_mask=None path)."""
    # TODO(synk): attn_mask branch (scores[mask == -inf] = 0 before softmax)
    # is not implemented; the reference default attn_mask=None is supported.
    assert attn_mask is None
    Wq, bq = params["wq_w"], params["wq_b"]
    Wo, bo = params["out_w"], params["out_b"]

    b, l1, d = q.shape
    b2, l2, d2 = k.shape
    b3, l3, d3 = v.shape
    assert b == b2 == b3 and l2 == l3 and d == d2 == d3
    hd = d // n_head
    assert hd * n_head == d

    # Fused projection: the reference applies wq to q, k AND v, so stack the
    # rows and run one pallas_call (the shared weight is streamed once).
    rows_q, rows_kv = b * l1, b * l2
    qkv_rows = jnp.concatenate(
        [q.reshape(rows_q, d), k.reshape(rows_kv, d), v.reshape(rows_kv, d)],
        axis=0)
    qkv_p = linear(qkv_rows, Wq, bq)
    qp = qkv_p[:rows_q]
    kp = qkv_p[rows_q:rows_q + rows_kv]
    vp = qkv_p[rows_q + rows_kv:]

    # Raw row-major head split, identical to torch .view(b*n_head, l, head_dim).
    qh = qp.reshape(b * n_head, l1, hd)
    kh = kp.reshape(b * n_head, l2, hd)
    vh = vp.reshape(b * n_head, l2, hd)

    av = scaled_dot_product_attention(qh, kh, vh, scale=1.0 / math.sqrt(hd))
    av = av.reshape(b * l1, d)          # == .view(b, l1, d_model)

    out = linear(av, Wo, bo)
    return out.reshape(b, l1, d)


# ----------------------------- pure-JAX reference ----------------------------

def _mha_reference(q, k, v, Wq, bq, Wo, bo, n_head):
    b, l1, d = q.shape
    _, l2, _ = k.shape
    hd = d // n_head
    qp = q @ Wq.T + bq
    kp = k @ Wq.T + bq
    vp = v @ Wq.T + bq
    qh = qp.reshape(b * n_head, l1, hd)
    kh = kp.reshape(b * n_head, l2, hd)
    vh = vp.reshape(b * n_head, l2, hd)
    s = jnp.einsum("bqd,bkd->bqk", qh, kh) / math.sqrt(hd)
    p = jax.nn.softmax(s, axis=-1)
    av = jnp.einsum("bqk,bkd->bqd", p, vh).reshape(b, l1, d)
    return av @ Wo.T + bo


if __name__ == "__main__":
    d_model, n_head = 32, 4
    batch, seq = 2, 8

    key = jax.random.PRNGKey(0)
    kq, kk, kv, kwq, kbq, kwo, kbo = jax.random.split(key, 7)
    q = jax.random.normal(kq, (batch, seq, d_model), dtype=jnp.float32)
    k = jax.random.normal(kk, (batch, seq, d_model), dtype=jnp.float32)
    v = jax.random.normal(kv, (batch, seq, d_model), dtype=jnp.float32)

    lim = 1.0 / math.sqrt(d_model)          # ~nn.Linear default init range
    Wq = jax.random.uniform(kwq, (d_model, d_model), jnp.float32, -lim, lim)
    bq = jax.random.uniform(kbq, (d_model,), jnp.float32, -lim, lim)
    Wo = jax.random.uniform(kwo, (d_model, d_model), jnp.float32, -lim, lim)
    bo = jax.random.uniform(kbo, (d_model,), jnp.float32, -lim, lim)
    params = dict(wq_w=Wq, wq_b=bq, out_w=Wo, out_b=bo)

    out = multihead_attention(q, k, v, params, n_head=n_head)
    out = jax.block_until_ready(out)
    assert out.shape == (batch, seq, d_model)

    ref = _mha_reference(q, k, v, Wq, bq, Wo, bo, n_head)
    max_err = float(jnp.max(jnp.abs(out - ref)))
    assert jnp.allclose(out, ref, atol=3e-2, rtol=3e-2), f"max_err={max_err}"

    print("KERNEL_OK")
</pallas_src>

<mosaic_0001>
module attributes {stable_mosaic.version = 11 : i64} {
  func.func @_linear_kernel(%arg0: i32, %arg1: i32, %arg2: i32, %arg3: memref<48x32xf32, #tpu.memory_space<vmem>>, %arg4: memref<32x32xf32, #tpu.memory_space<vmem>>, %arg5: memref<1x32xf32, #tpu.memory_space<vmem>>, %arg6: memref<48x32xf32, #tpu.memory_space<vmem>>, %arg7: memref<48x32xf32, #tpu.memory_space<vmem>>) attributes {dimension_semantics = [#tpu.dimension_semantics<parallel>, #tpu.dimension_semantics<parallel>, #tpu.dimension_semantics<arbitrary>], iteration_bounds = array<i64: 1, 1, 1>, scalar_prefetch = 0 : i64, scratch_operands = 1 : i64, tpu.core_type = #tpu.core_type<tc>, window_params = [{transform_indices = @transform_0, window_bounds = array<i64: 48, 32>}, {transform_indices = @transform_1, window_bounds = array<i64: 32, 32>}, {transform_indices = @transform_2, window_bounds = array<i64: 1, 32>}, {transform_indices = @transform_3, window_bounds = array<i64: 48, 32>}]} {
    %c0_i32 = arith.constant 0 : i32
    %0 = arith.cmpi eq, %arg2, %c0_i32 : i32
    %1 = arith.extui %0 : i1 to i32
    %c0_i32_0 = arith.constant 0 : i32
    %2 = arith.cmpi ne, %1, %c0_i32_0 : i32
    scf.if %2 {
      %cst_10 = arith.constant 0.000000e+00 : f32
      %14 = vector.broadcast %cst_10 : f32 to vector<48x32xf32>
      %c0_11 = arith.constant 0 : index
      %c0_12 = arith.constant 0 : index
      %15 = vector.load %arg7[%c0_11, %c0_12] : memref<48x32xf32, #tpu.memory_space<vmem>>, vector<48x32xf32>
      tpu.vector_store %arg7[%c0_11, %c0_12], %14 {strides = array<i32>} : memref<48x32xf32, #tpu.memory_space<vmem>>, vector<48x32xf32>,
    } else {
    }
    %c0 = arith.constant 0 : index
    %c0_1 = arith.constant 0 : index
    %3 = vector.load %arg3[%c0, %c0_1] : memref<48x32xf32, #tpu.memory_space<vmem>>, vector<48x32xf32>
    %4 = arith.truncf %3 : vector<48x32xf32> to vector<48x32xbf16>
    %c0_2 = arith.constant 0 : index
    %c0_3 = arith.constant 0 : index
    %5 = vector.load %arg4[%c0_2, %c0_3] : memref<32x32xf32, #tpu.memory_space<vmem>>, vector<32x32xf32>
    %6 = arith.truncf %5 : vector<32x32xf32> to vector<32x32xbf16>
    %c0_4 = arith.constant 0 : index
    %c0_5 = arith.constant 0 : index
    %7 = vector.load %arg7[%c0_4, %c0_5] : memref<48x32xf32, #tpu.memory_space<vmem>>, vector<48x32xf32>
    %cst = arith.constant dense<0.000000e+00> : vector<48x32xf32>
    %8 = tpu.matmul %4, %6, %cst {dimension_numbers = #tpu.dot_dimension_numbers<[1], [1], [0], [0], [0, 0, 1, 0], [], []>} : vector<48x32xbf16>, vector<32x32xbf16>, vector<48x32xf32> -> vector<48x32xf32>
    %9 = arith.addf %7, %8 : vector<48x32xf32>
    %c0_6 = arith.constant 0 : index
    %c0_7 = arith.constant 0 : index
    %10 = vector.load %arg7[%c0_6, %c0_7] : memref<48x32xf32, #tpu.memory_space<vmem>>, vector<48x32xf32>
    tpu.vector_store %arg7[%c0_6, %c0_7], %9 {strides = array<i32>} : memref<48x32xf32, #tpu.memory_space<vmem>>, vector<48x32xf32>,
    %c0_i32_8 = arith.constant 0 : i32
    %11 = arith.cmpi eq, %arg2, %c0_i32_8 : i32
    %12 = arith.extui %11 : i1 to i32
    %c0_i32_9 = arith.constant 0 : i32
    %13 = arith.cmpi ne, %12, %c0_i32_9 : i32
    scf.if %13 {
      %c0_10 = arith.constant 0 : index
      %c0_11 = arith.constant 0 : index
      %14 = vector.load %arg7[%c0_10, %c0_11] : memref<48x32xf32, #tpu.memory_space<vmem>>, vector<48x32xf32>
      %c0_12 = arith.constant 0 : index
      %c0_13 = arith.constant 0 : index
      %15 = vector.load %arg5[%c0_12, %c0_13] : memref<1x32xf32, #tpu.memory_space<vmem>>, vector<1x32xf32>
      %16 = vector.broadcast %15 : vector<1x32xf32> to vector<48x32xf32>
      %17 = arith.addf %14, %16 : vector<48x32xf32>
      %c0_14 = arith.constant 0 : index
      %c0_15 = arith.constant 0 : index
      %18 = vector.load %arg6[%c0_14, %c0_15] : memref<48x32xf32, #tpu.memory_space<vmem>>, vector<48x32xf32>
      tpu.vector_store %arg6[%c0_14, %c0_15], %17 {strides = array<i32>} : memref<48x32xf32, #tpu.memory_space<vmem>>, vector<48x32xf32>,
    } else {
    }
    return
  }
  func.func @transform_0(%arg0: i32, %arg1: i32, %arg2: i32) -> (i32, i32) {
    %c0_i32 = arith.constant 0 : i32
    return %arg0, %arg2 : i32, i32
  }
  func.func @transform_1(%arg0: i32, %arg1: i32, %arg2: i32) -> (i32, i32) {
    %c0_i32 = arith.constant 0 : i32
    return %arg1, %arg2 : i32, i32
  }
  func.func @transform_2(%arg0: i32, %arg1: i32, %arg2: i32) -> (i32, i32) {
    %c0_i32 = arith.constant 0 : i32
    %c0_i32_0 = arith.constant 0 : i32
    return %c0_i32, %arg1 : i32, i32
  }
  func.func @transform_3(%arg0: i32, %arg1: i32, %arg2: i32) -> (i32, i32) {
    %c0_i32 = arith.constant 0 : i32
    return %arg0, %arg1 : i32, i32
  }
}

</mosaic_0001>

<bundles_post_ra>
// kernel: tpu_custom_call.1
= control target key start
LH: loop header
LB: loop body
LE: loop exit
PB: predicated region body
PF: predicated region fallthrough
CT: control target
= control target key end

     0   :  { %vm19_vm0 = vcmask 261120   ;;  %v195_v0 = vmov 0.0   ;;  %vm196_vm1 = vmmov 0   ;;  %s294_s1 = inlined_call_operand.vmem [shape: f32[32,32], index: 1, kind: input, shape index: {}]   ;;  %s295_s0 = inlined_call_operand.vmem [shape: f32[48,32], index: 0, kind: input, shape index: {}]   ;;  %s296_s2 = inlined_call_operand.vmem [shape: f32[1,32], index: 2, kind: input, shape index: {}]   ;;  %s297_s3 = inlined_call_operand.vmem [shape: f32[48,32], index: 3, kind: output, shape index: {}]  }
   0x1   :  { %189 = vmatprep.subr.bf16.mxu1 %v195_v0  ;;  %v37_v1 = vld [vmem:[%s294_s1 + $0x10] sm:$0xff]  ;;  %v38_v2 = vld [vmem:[%s294_s1 + $0x18] sm:$0xff]  ;;  %20 = vst.msk [vmem:[#allocation2] sm:$0xff] %vm19_vm0, %v195_v0  ;;  %21 = vst.msk [vmem:[#allocation2 + $0x8] sm:$0xff] %vm19_vm0, %v195_v0  ;;  %173 = vmatprep.subr.bf16.mxu0 %v195_v0 }
   0x2   :  { %22 = vst.msk [vmem:[#allocation2 + $0x10] sm:$0xff] %vm19_vm0, %v195_v0  ;;  %23 = vst.msk [vmem:[#allocation2 + $0x18] sm:$0xff] %vm19_vm0, %v195_v0  ;;  %v40_v3 = vpack.c.bf16 %v38_v2, %v37_v1  ;;  %181 = vmatprep.mubr.msk.bf16.mxu1 %vm196_vm1, %v195_v0  ;;  %177 = vmatprep.mubr.msk.bf16.mxu0 %vm196_vm1, %v195_v0  ;;  %v35_v4 = vld [vmem:[%s294_s1] sm:$0xff]  ;;  %v36_v5 = vld [vmem:[%s294_s1 + $0x8] sm:$0xff] }
   0x3   :  { %24 = vst.msk [vmem:[#allocation2 + $0x20] sm:$0xff] %vm19_vm0, %v195_v0  ;;  %25 = vst.msk [vmem:[#allocation2 + $0x28] sm:$0xff] %vm19_vm0, %v195_v0  ;;  %v39_v7 = vpack.c.bf16 %v36_v5, %v35_v4  ;;  %v28_v9 = vld [vmem:[%s295_s0 + $0x10] sm:$0xff]  ;;  %v29_v10 = vld [vmem:[%s295_s0 + $0x18] sm:$0xff] }
   0x4   :  { %v61_v6 = vsel %vm19_vm0, %v40_v3, 0  ;;  %v26_v11 = vld [vmem:[%s295_s0] sm:$0xff]  ;;  %v27_v12 = vld [vmem:[%s295_s0 + $0x8] sm:$0xff]  ;;  %v33_v13 = vpack.c.bf16 %v29_v10, %v28_v9 }
   0x5   :  { %191 = vmatpush3.bf16.xpose.msra.mxu1 %v61_v6  ;;  %174 = vmatpush3.bf16.xpose.msra.mxu0 %v61_v6  ;;  %v58_v8 = vsel %vm19_vm0, %v39_v7, 0  ;;  %v32_v14 = vpack.c.bf16 %v27_v12, %v26_v11  ;;  %v30_v15 = vld [vmem:[%s295_s0 + $0x20] sm:$0xff]  ;;  %v31_v16 = vld [vmem:[%s295_s0 + $0x28] sm:$0xff] }
   0x6   :  { %190 = vmatprep.subr.bf16.mxu1 %v195_v0  ;;  %175 = vmatprep.subr.bf16.mxu0 %v195_v0  ;;  %v34_v17 = vpack.c.bf16 %v31_v16, %v30_v15  ;;  %v167_v35 = vld [vmem:[%s296_s2] ss:$0 sm:$0xff] }
   0x8   :  { %v41_v19 = vld [vmem:[#allocation2] sm:$0xff]  ;;  %v42_v27 = vld [vmem:[#allocation2 + $0x8] sm:$0xff] }
   0x9   :  { %v43_v18 = vld [vmem:[#allocation2 + $0x10] sm:$0xff]  ;;  %v44_v26 = vld [vmem:[#allocation2 + $0x18] sm:$0xff] }
   0xa   :  { %v45_v34 = vld [vmem:[#allocation2 + $0x20] sm:$0xff]  ;;  %v46_v41 = vld [vmem:[#allocation2 + $0x28] sm:$0xff] }
   0xd   :  { %192 = vmatpush3.bf16.xpose.msra.mxu1 %v58_v8  ;;  %176 = vmatpush3.bf16.xpose.msra.mxu0 %v58_v8 }
  0x14   :  { %182 = vmatmul.mubr.msk.bf16.vlgmr.msra.gmra.mxu1 %vm19_vm0, %v33_v13  ;;  %178 = vmatmul.mubr.msk.bf16.vlgmr.msra.gmra.mxu0 %vm19_vm0, %v32_v14 }
  0x15   :  { %185 = vmatprep.mubr.msk.bf16.mxu1 %vm196_vm1, %v195_v0 }
  0x1c   :  { %186 = vmatmul.mubr.msk.bf16.gmra.mxu1 %vm19_vm0, %v34_v17 }
  0xd4   :  { %v105_v20 = vpop.f32.mrf.mxu1  ;;  %v97_v21 = vpop.f32.mrf.mxu0 }
  0xd5   :  { %v122_v22 = vadd.f32 %v105_v20, %v43_v18  ;;  %v120_v23 = vadd.f32 %v97_v21, %v41_v19 }
  0xd6   :  { %v183_v24 = vpop.f32.mrf.mxu1  ;;  %v179_v25 = vpop.f32.mrf.mxu0 }
  0xd7   :  { %128 = vst.msk [vmem:[#allocation2 + $0x10] sm:$0xff] %vm19_vm0, %v122_v22  ;;  %126 = vst.msk [vmem:[#allocation2] sm:$0xff] %vm19_vm0, %v120_v23 }
  0xd8   :  { %v108_v28 = vpop.f32.mrf.mxu1  ;;  %v100_v29 = vpop.f32.mrf.mxu0 }
  0xd9   :  { %v123_v30 = vadd.f32 %v108_v28, %v44_v26  ;;  %v121_v31 = vadd.f32 %v100_v29, %v42_v27 }
  0xda   :  { %v184_v32 = vpop.f32.mrf.mxu1  ;;  %v180_v33 = vpop.f32.mrf.mxu0 }
  0xdb   :  { %129 = vst.msk [vmem:[#allocation2 + $0x18] sm:$0xff] %vm19_vm0, %v123_v30  ;;  %127 = vst.msk [vmem:[#allocation2 + $0x8] sm:$0xff] %vm19_vm0, %v121_v31 }
  0xdc   :  { %v113_v36 = vpop.f32.mrf.mxu1 }
  0xdd   :  { %v124_v37 = vadd.f32 %v113_v36, %v45_v34 }
  0xde   :  { %v137_v38 = vld [vmem:[#allocation2 + $0x10] sm:$0xff]  ;;  %v135_v39 = vld [vmem:[#allocation2] sm:$0xff]  ;;  %v187_v40 = vpop.f32.mrf.mxu1 }
  0xdf   :  { %v150_v42 = vadd.f32 %v167_v35, %v137_v38  ;;  %v148_v43 = vadd.f32 %v167_v35, %v135_v39  ;;  %130 = vst.msk [vmem:[#allocation2 + $0x20] sm:$0xff] %vm19_vm0, %v124_v37 }
  0xe0   :  { %v116_v44 = vpop.f32.mrf.mxu1 }
  0xe1   :  { %156 = vst.msk [vmem:[%s297_s3 + $0x10] sm:$0xff] %vm19_vm0, %v150_v42  ;;  %154 = vst.msk [vmem:[%s297_s3] sm:$0xff] %vm19_vm0, %v148_v43  ;;  %v125_v45 = vadd.f32 %v116_v44, %v46_v41 }
  0xe2   :  { %v138_v46 = vld [vmem:[#allocation2 + $0x18] sm:$0xff]  ;;  %v136_v47 = vld [vmem:[#allocation2 + $0x8] sm:$0xff]  ;;  %v188_v48 = vpop.f32.mrf.mxu1 }
  0xe3   :  { %v151_v49 = vadd.f32 %v167_v35, %v138_v46  ;;  %v149_v50 = vadd.f32 %v167_v35, %v136_v47  ;;  %131 = vst.msk [vmem:[#allocation2 + $0x28] sm:$0xff] %vm19_vm0, %v125_v45 }
  0xe5   :  { %157 = vst.msk [vmem:[%s297_s3 + $0x18] sm:$0xff] %vm19_vm0, %v151_v49  ;;  %155 = vst.msk [vmem:[%s297_s3 + $0x8] sm:$0xff] %vm19_vm0, %v149_v50 }
  0xe6   :  { %v139_v51 = vld [vmem:[#allocation2 + $0x20] sm:$0xff] }
  0xe7   :  { %v152_v52 = vadd.f32 %v167_v35, %v139_v51 }
  0xe9   :  { %158 = vst.msk [vmem:[%s297_s3 + $0x20] sm:$0xff] %vm19_vm0, %v152_v52 }
  0xea   :  { %v140_v53 = vld [vmem:[#allocation2 + $0x28] sm:$0xff] }
  0xeb   :  { %v153_v54 = vadd.f32 %v167_v35, %v140_v53 }
  0xed   :  { %159 = vst.msk [vmem:[%s297_s3 + $0x28] sm:$0xff] %vm19_vm0, %v153_v54 }

</bundles_post_ra>
